<compile_context>
chip_gen: v5e
topology: v5e:2x2
jax: 0.10.0
libtpu: 0.0.40
codegen_flags: <defaults>
</compile_context>

<pallas_src>
import jax
import jax.numpy as jnp
from jax.experimental import pallas as pl
from jax.experimental.pallas import tpu as pltpu


def _round_up(x: int, m: int) -> int:
    return ((x + m - 1) // m) * m


def ncf_kernel(c_ref, w1_ref, b1_ref, w2_ref, b2_ref, o_ref):
    # c_ref:  (2E, TB) bf16  transposed concat([user_emb, book_emb]) tile (batch on lanes)
    # w1_ref: (H, 2E)  bf16  fc1 weight (PyTorch layout; no transpose needed)
    # b1_ref: (H, 1)   f32   fc1 bias (column)
    # w2_ref: (H, 1)   f32   fc2 weight (column == fc2_w.T)
    # b2_ref: (1, 1)   f32   fc2 bias
    # o_ref:  (1, TB)  f32   sigmoid output (lane-dense)
    h = jnp.dot(w1_ref[...], c_ref[...], preferred_element_type=jnp.float32)  # (H, TB)
    h = jnp.maximum(h + b1_ref[...], 0.0)                                     # bias + ReLU, f32
    # fc2: output width 1 -> VPU multiply + sublane (XLU) reduction.
    logits = jnp.sum(h * w2_ref[...], axis=0, keepdims=True) + b2_ref[...]    # (1, TB)
    o_ref[...] = jax.nn.sigmoid(logits)


def ncf_forward(user_ids, book_ids, params, *, batch_block: int = 8192):
    """NCF forward. Embedding gather is glue (XLA); the MLP runs in Pallas."""
    user_tab = params["user_embedding"]          # (num_users, E) f32
    book_tab = params["book_embedding"]          # (num_books, E) f32
    w1 = params["fc1_w"]                         # (H, 2E)
    b1 = params["fc1_b"]                         # (H,)
    w2 = params["fc2_w"]                         # (1, H)
    b2 = params["fc2_b"]                         # (1,)

    E = user_tab.shape[1]
    H = w1.shape[0]
    B = user_ids.shape[0]

    # Embedding lookup (glue), streamed to the kernel as bf16 to halve HBM bytes.
    # TODO(synk): fuse the gather into the kernel (scalar-prefetch ids + manual DMA
    # gather of table rows) to avoid materializing the gathered rows in HBM.
    u = user_tab[user_ids].astype(jnp.bfloat16)   # (B, E)
    bk = book_tab[book_ids].astype(jnp.bfloat16)  # (B, E)
    c_t = jnp.concatenate([u, bk], axis=1).T      # (2E, B)  lane-dense along batch

    # Batch tile: multiple of 128 lanes, large enough to amortize per-step overhead
    # (~0.35us/step), small enough to fit comfortably in scoped VMEM on v5e/v6e/v7x
    # (bf16 (2E, 8192) tile = 2E*16 KiB; with 2E=32 that's 512 KiB x2 buffers).
    tb = min(batch_block, _round_up(B, 128))
    b_pad = _round_up(B, tb)
    if b_pad != B:
        c_t = jnp.pad(c_t, ((0, 0), (0, b_pad - B)))   # zero pad -> sigmoid stays finite

    w1_bf = w1.astype(jnp.bfloat16)                        # (H, 2E)
    b1_col = b1.reshape(H, 1).astype(jnp.float32)          # (H, 1)
    w2_col = w2.reshape(H, 1).astype(jnp.float32)          # (H, 1)
    b2_2d = b2.reshape(1, 1).astype(jnp.float32)           # (1, 1)

    const_map = lambda i: (0, 0)
    out = pl.pallas_call(
        ncf_kernel,
        out_shape=jax.ShapeDtypeStruct((1, b_pad), jnp.float32),
        grid=(b_pad // tb,),
        in_specs=[
            pl.BlockSpec((2 * E, tb), lambda i: (0, i)),   # activation: tiled over batch
            pl.BlockSpec((H, 2 * E), const_map),           # fc1 weight: VMEM-resident
            pl.BlockSpec((H, 1), const_map),               # fc1 bias
            pl.BlockSpec((H, 1), const_map),               # fc2 weight column
            pl.BlockSpec((1, 1), const_map),               # fc2 bias
        ],
        out_specs=pl.BlockSpec((1, tb), lambda i: (0, i)),
        compiler_params=pltpu.CompilerParams(
            dimension_semantics=("parallel",),
        ),
    )(c_t, w1_bf, b1_col, w2_col, b2_2d)

    return out[0, :B].reshape(B, 1)


def init_params(key, num_users, num_books, embedding_dim, hidden_dim):
    """Deterministic init matching PyTorch default init distributions (f32)."""
    k = jax.random.split(key, 6)
    # nn.Embedding default: N(0, 1)
    user_embedding = jax.random.normal(k[0], (num_users, embedding_dim), jnp.float32)
    book_embedding = jax.random.normal(k[1], (num_books, embedding_dim), jnp.float32)
    # nn.Linear default: U(-1/sqrt(fan_in), 1/sqrt(fan_in))
    fan1 = embedding_dim * 2
    lim1 = 1.0 / jnp.sqrt(fan1)
    fc1_w = jax.random.uniform(k[2], (hidden_dim, fan1), jnp.float32, -lim1, lim1)
    fc1_b = jax.random.uniform(k[3], (hidden_dim,), jnp.float32, -lim1, lim1)
    lim2 = 1.0 / jnp.sqrt(hidden_dim)
    fc2_w = jax.random.uniform(k[4], (1, hidden_dim), jnp.float32, -lim2, lim2)
    fc2_b = jax.random.uniform(k[5], (1,), jnp.float32, -lim2, lim2)
    return {
        "user_embedding": user_embedding,
        "book_embedding": book_embedding,
        "fc1_w": fc1_w,
        "fc1_b": fc1_b,
        "fc2_w": fc2_w,
        "fc2_b": fc2_b,
    }


def ncf_reference(user_ids, book_ids, params):
    """Pure-JAX f32 reference of the PyTorch forward."""
    u = params["user_embedding"][user_ids]
    bk = params["book_embedding"][book_ids]
    combined = jnp.concatenate([u, bk], axis=1)
    h = combined @ params["fc1_w"].T + params["fc1_b"]
    h = jnp.maximum(h, 0.0)
    logits = h @ params["fc2_w"].T + params["fc2_b"]
    return jax.nn.sigmoid(logits)


if __name__ == "__main__":
    num_users, num_books = 10, 12
    embedding_dim, hidden_dim = 16, 32
    batch = 8

    key = jax.random.PRNGKey(0)
    pkey, ukey, bkey = jax.random.split(key, 3)
    params = init_params(pkey, num_users, num_books, embedding_dim, hidden_dim)

    user_ids = jax.random.randint(ukey, (batch,), 0, num_users, dtype=jnp.int32)
    book_ids = jax.random.randint(bkey, (batch,), 0, num_books, dtype=jnp.int32)

    out = ncf_forward(user_ids, book_ids, params)
    out = jax.block_until_ready(out)

    ref = ncf_reference(user_ids, book_ids, params)
    assert out.shape == (batch, 1), out.shape
    # bf16 streaming of embeddings / fc1 weights -> bf16-appropriate tolerance.
    assert jnp.allclose(out, ref, atol=2e-2, rtol=2e-2), (out, ref)

    print("KERNEL_OK")
</pallas_src>

<mosaic_0001>
module attributes {stable_mosaic.version = 11 : i64} {
  func.func @ncf_kernel(%arg0: i32, %arg1: memref<32x128xbf16, #tpu.memory_space<vmem>>, %arg2: memref<32x32xbf16, #tpu.memory_space<vmem>>, %arg3: memref<32x1xf32, #tpu.memory_space<vmem>>, %arg4: memref<32x1xf32, #tpu.memory_space<vmem>>, %arg5: memref<1x1xf32, #tpu.memory_space<vmem>>, %arg6: memref<1x128xf32, #tpu.memory_space<vmem>>) attributes {dimension_semantics = [#tpu.dimension_semantics<parallel>], iteration_bounds = array<i64: 1>, scalar_prefetch = 0 : i64, scratch_operands = 0 : i64, tpu.core_type = #tpu.core_type<tc>, window_params = [{transform_indices = @transform_0, window_bounds = array<i64: 32, 128>}, {pipeline_mode = #tpu.pipeline_mode<synchronous>, transform_indices = @transform_1, window_bounds = array<i64: 32, 32>}, {pipeline_mode = #tpu.pipeline_mode<synchronous>, transform_indices = @transform_2, window_bounds = array<i64: 32, 1>}, {pipeline_mode = #tpu.pipeline_mode<synchronous>, transform_indices = @transform_3, window_bounds = array<i64: 32, 1>}, {pipeline_mode = #tpu.pipeline_mode<synchronous>, transform_indices = @transform_4, window_bounds = array<i64: 1, 1>}, {transform_indices = @transform_5, window_bounds = array<i64: 1, 128>}]} {
    %c0 = arith.constant 0 : index
    %c0_0 = arith.constant 0 : index
    %0 = vector.load %arg2[%c0, %c0_0] : memref<32x32xbf16, #tpu.memory_space<vmem>>, vector<32x32xbf16>
    %c0_1 = arith.constant 0 : index
    %c0_2 = arith.constant 0 : index
    %1 = vector.load %arg1[%c0_1, %c0_2] : memref<32x128xbf16, #tpu.memory_space<vmem>>, vector<32x128xbf16>
    %cst = arith.constant dense<0.000000e+00> : vector<32x128xf32>
    %2 = tpu.matmul %0, %1, %cst {dimension_numbers = #tpu.dot_dimension_numbers<[1], [0], [0], [1], [0, 0, 1, 1], [], []>} : vector<32x32xbf16>, vector<32x128xbf16>, vector<32x128xf32> -> vector<32x128xf32>
    %c0_3 = arith.constant 0 : index
    %c0_4 = arith.constant 0 : index
    %3 = vector.load %arg3[%c0_3, %c0_4] : memref<32x1xf32, #tpu.memory_space<vmem>>, vector<32x1xf32>
    %4 = vector.broadcast %3 : vector<32x1xf32> to vector<32x128xf32>
    %5 = arith.addf %2, %4 : vector<32x128xf32>
    %cst_5 = arith.constant 0.000000e+00 : f32
    %6 = vector.broadcast %cst_5 : f32 to vector<32x128xf32>
    %7 = arith.maximumf %5, %6 : vector<32x128xf32>
    %c0_6 = arith.constant 0 : index
    %c0_7 = arith.constant 0 : index
    %8 = vector.load %arg4[%c0_6, %c0_7] : memref<32x1xf32, #tpu.memory_space<vmem>>, vector<32x1xf32>
    %9 = vector.broadcast %8 : vector<32x1xf32> to vector<32x128xf32>
    %10 = arith.mulf %7, %9 : vector<32x128xf32>
    %cst_8 = arith.constant dense<0.000000e+00> : vector<128xf32>
    %11 = vector.multi_reduction <add>, %10, %cst_8 [0] : vector<32x128xf32> to vector<128xf32>
    %12 = vector.shape_cast %11 : vector<128xf32> to vector<1x128xf32>
    %c0_9 = arith.constant 0 : index
    %c0_10 = arith.constant 0 : index
    %13 = vector.load %arg5[%c0_9, %c0_10] : memref<1x1xf32, #tpu.memory_space<vmem>>, vector<1x1xf32>
    %14 = vector.broadcast %13 : vector<1x1xf32> to vector<1x128xf32>
    %15 = arith.addf %12, %14 : vector<1x128xf32>
    %16 = arith.negf %15 : vector<1x128xf32>
    %17 = math.exp %16 : vector<1x128xf32>
    %cst_11 = arith.constant 1.000000e+00 : f32
    %18 = vector.broadcast %cst_11 : f32 to vector<1x128xf32>
    %19 = arith.addf %18, %17 : vector<1x128xf32>
    %20 = arith.divf %18, %19 : vector<1x128xf32>
    %c0_12 = arith.constant 0 : index
    %c0_13 = arith.constant 0 : index
    %21 = vector.load %arg6[%c0_12, %c0_13] : memref<1x128xf32, #tpu.memory_space<vmem>>, vector<1x128xf32>
    tpu.vector_store %arg6[%c0_12, %c0_13], %20 {strides = array<i32>} : memref<1x128xf32, #tpu.memory_space<vmem>>, vector<1x128xf32>,
    return
  }
  func.func @transform_0(%arg0: i32) -> (i32, i32) {
    %c0_i32 = arith.constant 0 : i32
    %c0_i32_0 = arith.constant 0 : i32
    return %c0_i32, %arg0 : i32, i32
  }
  func.func @transform_1(%arg0: i32) -> (i32, i32) {
    %c0_i32 = arith.constant 0 : i32
    %c0_i32_0 = arith.constant 0 : i32
    %c0_i32_1 = arith.constant 0 : i32
    return %c0_i32, %c0_i32_0 : i32, i32
  }
  func.func @transform_2(%arg0: i32) -> (i32, i32) {
    %c0_i32 = arith.constant 0 : i32
    %c0_i32_0 = arith.constant 0 : i32
    %c0_i32_1 = arith.constant 0 : i32
    return %c0_i32, %c0_i32_0 : i32, i32
  }
  func.func @transform_3(%arg0: i32) -> (i32, i32) {
    %c0_i32 = arith.constant 0 : i32
    %c0_i32_0 = arith.constant 0 : i32
    %c0_i32_1 = arith.constant 0 : i32
    return %c0_i32, %c0_i32_0 : i32, i32
  }
  func.func @transform_4(%arg0: i32) -> (i32, i32) {
    %c0_i32 = arith.constant 0 : i32
    %c0_i32_0 = arith.constant 0 : i32
    %c0_i32_1 = arith.constant 0 : i32
    return %c0_i32, %c0_i32_0 : i32, i32
  }
  func.func @transform_5(%arg0: i32) -> (i32, i32) {
    %c0_i32 = arith.constant 0 : i32
    %c0_i32_0 = arith.constant 0 : i32
    return %c0_i32, %arg0 : i32, i32
  }
}

</mosaic_0001>

<bundles_post_ra>
// kernel: tpu_custom_call.1
= control target key start
LH: loop header
LB: loop body
LE: loop exit
PB: predicated region body
PF: predicated region fallthrough
CT: control target
= control target key end

     0   :  { %s323_s0 = inlined_call_operand.vmem [shape: bf16[32,128], index: 0, kind: input, shape index: {}]   ;;  %s324_s1 = inlined_call_operand.vmem [shape: bf16[32,32], index: 1, kind: input, shape index: {}]   ;;  %s325_s2 = inlined_call_operand.vmem [shape: f32[32,1], index: 2, kind: input, shape index: {}]   ;;  %s326_s3 = inlined_call_operand.vmem [shape: f32[32,1], index: 3, kind: input, shape index: {}]   ;;  %s327_s4 = inlined_call_operand.<no memory space> [shape: f32[1,1], index: 4, kind: input, shape index: {}]   ;;  %s328_s5 = inlined_call_operand.hbm [shape: f32[1,128], index: 5, kind: output, shape index: {}]  }
   0x1   :  { %v10_v0 = vstv %s327_s4 }
   0x2   :  { %11 = vst [vmem:[#allocation2] sm:$0x1] %v10_v0 }
   0x3   :  { %v32_v1 = vld [vmem:[%s325_s2] sm:$0xff]  ;;  %v211_v2 = vld [vmem:[%s323_s0 + $0x8] sm:$0xff]  ;;  %v34_v3 = vld [vmem:[%s325_s2 + $0x10] sm:$0xff]  ;;  %v249_v4 = vmov 0  }
   0x4   :  { %216 = vset.pattern.permute.xlu0 %v249_v4  ;;  %217 = vset.pattern.permute.xlu1 %v249_v4  ;;  %v210_v5 = vld [vmem:[%s323_s0] sm:$0xff] }
   0x5   :  { %38 = vperm.xlu0 %216, %v32_v1   ;;  %91 = vmatpush.bf16.msra.mxu0 %v211_v2  ;;  %v108_v6 = vld [vmem:[%s326_s3] sm:$0xff] }
   0x6   :  { %212 = vmatpush.bf16.msra.mxu1 %v211_v2  ;;  %48 = vperm.xlu1 %217, %v34_v3  }
   0x7   :  { %218 = vset.pattern.permute.xlu2 %v249_v4 }
   0x8   :  { %12 = vsyncpa [#allocation4], 0  ;;  %v208_v7 = vld [vmem:[%s324_s1] sm:$0xff]  ;;  %114 = vperm.xlu2 %218, %v108_v6   ;;  %vm78_vm0 = vcmask 261120   ;;  %v209_v8 = vld [vmem:[%s324_s1 + $0x8] sm:$0xff]  ;;  %s180_s18 = sshll.u32 %s328_s5, 4  ;;  %s181_s18 = int_to_ptr.hbm [resolvable:$true] %s180_s18 }
   0x9   :  { %92 = vmatpush.bf16.msra.mxu0 %v210_v5  ;;  %v33_v9 = vld [vmem:[%s325_s2 + $0x8] sm:$0xff]  ;;  %v35_v10 = vld [vmem:[%s325_s2 + $0x18] sm:$0xff]  ;;  %v110_v12 = vld [vmem:[%s326_s3 + $0x10] sm:$0xff]  ;;  %s250_s2 = smov [#allocation3]  }
   0xa   :  { %213 = vmatpush.bf16.msra.mxu1 %v210_v5  ;;  %v109_v11 = vld [vmem:[%s326_s3 + $0x8] sm:$0xff]  ;;  %v111_v13 = vld [vmem:[%s326_s3 + $0x18] sm:$0xff]  ;;  %v145_v14 = vld [vmem:[#allocation2] sm:$0x1]  ;;  %s178_s3 = sshll.u32 %s250_s2, 4  ;;  %s179_s3 = int_to_ptr.vmem [resolvable:$true] %s178_s3 }
   0xc   :  { %205 = vmatmul.msk.bf16.vlgmr.msra.gmra.mxu0 %vm78_vm0, %v208_v7 }
   0xd   :  { %206 = vmatmul.msk.bf16.vlgmr.msra.gmra.mxu1 %vm78_vm0, %v209_v8  ;;  %43 = vperm.xlu0 %216, %v33_v9  }
   0xe   :  { %53 = vperm.xlu1 %217, %v35_v10  }
  0x10   :  { %119 = vperm.xlu2 %218, %v109_v11  }
  0x15   :  { %124 = vperm.xlu0 %216, %v110_v12  }
  0x16   :  { %129 = vperm.xlu1 %217, %v111_v13  }
  0x18   :  { %148 = vperm.xlu2 %218, %v145_v14  }
  0x62   :  { %v115_v19 = vpop.permute.xlu2 %114 }
  0x6a   :  { %v120_v31 = vpop.permute.xlu2 %119 }
  0x72   :  { %v149_v46 = vpop.permute.xlu2 %148 }
  0x73   :  { %v151_v48 = vperm.slane %v149_v46, 0 }
  0x77   :  { %v39_v15 = vpop.permute.xlu0 %38 }
  0x78   :  { %v49_v16 = vpop.permute.xlu1 %48 }
  0x7f   :  { %v44_v20 = vpop.permute.xlu0 %43 }
  0x80   :  { %v54_v22 = vpop.permute.xlu1 %53 }
  0x87   :  { %v125_v35 = vpop.permute.xlu0 %124 }
  0x88   :  { %v130_v38 = vpop.permute.xlu1 %129 }
  0x89   :  { %v94_v17 = vpop.f32.mrf.mxu0 }
  0x8a   :  { %v99_v18 = vpop.f32.mrf.mxu1  ;;  %v95_v21 = vadd.f32 %v94_v17, %v39_v15 }
  0x8b   :  { %v100_v23 = vadd.f32 %v99_v18, %v49_v16 }
  0x8c   :  { %v104_v25 = vmax.f32 %v95_v21, 0.0 }
  0x8d   :  { %v106_v29 = vmax.f32 %v100_v23, 0.0 }
  0x8e   :  { %v132_v32 = vmul.f32 %v115_v19, %v104_v25 }
  0x8f   :  { %v134_v36 = vmul.f32 %v125_v35, %v106_v29 }
  0x91   :  { %v96_v24 = vpop.f32.mrf.mxu0 }
  0x92   :  { %v97_v26 = vadd.f32 %v96_v24, %v44_v20  ;;  %v101_v27 = vpop.f32.mrf.mxu1 }
  0x93   :  { %v102_v28 = vadd.f32 %v101_v27, %v54_v22 }
  0x94   :  { %v105_v30 = vmax.f32 %v97_v26, 0.0 }
  0x95   :  { %v107_v34 = vmax.f32 %v102_v28, 0.0 }
  0x96   :  { %v133_v33 = vmul.f32 %v120_v31, %v105_v30 }
  0x97   :  { %v135_v39 = vmul.f32 %v130_v38, %v107_v34 }
  0x98   :  { %v136_v37 = vadd.f32 %v133_v33, %v132_v32 }
  0x9a   :  { %v137_v40 = vadd.f32 %v136_v37, %v134_v36 }
  0x9c   :  { %v138_v41 = vadd.f32 %v137_v40, %v135_v39 }
  0x9e   :  { %v139_v42 = vrot.slane %v138_v41, 4 }
  0xa0   :  { %v140_v43 = vadd.f32 %v139_v42, %v138_v41 }
  0xa2   :  { %v141_v44 = vrot.slane %v140_v43, 2 }
  0xa4   :  { %v142_v45 = vadd.f32 %v141_v44, %v140_v43 }
  0xa6   :  { %v143_v47 = vrot.slane %v142_v45, 1 }
  0xa8   :  { %v144_v49 = vadd.f32 %v143_v47, %v142_v45 }
  0xaa   :  { %v152_v50 = vadd.f32 %v151_v48, %v144_v49 }
  0xac   :  { %v207_v51 = vmul.f32 -1.442695, %v152_v50 }
  0xae   :  { %219 = vpow2.f32 %v207_v51 }
  0xb4   :  { %v220_v52 = vpop.eup %219 }
  0xb5   :  { %v156_v53 = vadd.f32 1.0, %v220_v52 }
  0xb7   :  { %221 = vrcp.f32 %v156_v53  ;;  %v168_v57 = vand.u32 2147483648, %v156_v53  ;;  %v166_v59 = vand.u32 2147483647, %v156_v53  ;;  %vm162_vm2 = vweird.f32 %v156_v53 }
  0xb9   :  { %v169_v61 = vor.u32 1.1754944e-38, %v168_v57  ;;  %vm167_vm4 = vcmp.eq.f32.partialorder %v166_v59, 8.507059e+37 }
  0xbd   :  { %v222_v54 = vpop.eup %221 }
  0xbe   :  { %v158_v55 = vmul.f32 %v222_v54, %v156_v53  ;;  %vm163_vm1 = vweird.f32 %v222_v54 }
  0xbf   :  { %vm164_vm3 = vmor %vm162_vm2, %vm163_vm1 }
  0xc0   :  { %v159_v56 = vsub.f32 1.0, %v158_v55 }
  0xc2   :  { %v160_v58 = vmul.f32 %v222_v54, %v159_v56 }
  0xc4   :  { %v161_v60 = vadd.f32 %v222_v54, %v160_v58 }
  0xc6   :  { %v165_v62 = vsel %vm164_vm3, %v222_v54, %v161_v60 }
  0xc7   :  { %v170_v63 = vsel %vm167_vm4, %v169_v61, %v165_v62 }
  0xc8   :  { %172 = vst [vmem:[#allocation3] sm:$0x1] %v170_v63 }
  0xc9   :  { %183 = dma.vmem_to_hbm [thread:$0]  %s179_s3, 16, %s181_s18, [#allocation4]  }
  0xca   :  { %247 = dma.done.wait [#allocation4], 16  }
  0xcb   :  { %248 = vsyncadd [#allocation4], 4294967280 }
  0xcc   :  { %188 = vsyncpa [#allocation4], 1 }

</bundles_post_ra>
